<compile_context>
chip_gen: v6e
topology: v6e:2x2x1
jax: 0.10.0
libtpu: 0.0.40
codegen_flags: <defaults>
</compile_context>

<pallas_src>
import functools
import math

import jax
import jax.numpy as jnp
from jax import lax
from jax.experimental import pallas as pl
from jax.experimental.pallas import tpu as pltpu


def _cdiv(a, b):
    return -(-a // b)


def _make_kernel(kH, kW, Cin, Wr, TH):
    """Per-(sample, cout-tile, row-tile) conv-transpose kernel."""
    L = TH * Wr  # lanes per output slab

    def kernel(x_ref, w_ref, b_ref, o_ref, col_ref):
        # x_ref  : (1, 1, Cin, Lw)   one row-tile's flattened padded rows (+halo)
        # w_ref  : (TCo, K)          K-folded, flipped weights (K = kH*kW*Cin)
        # b_ref  : (TCo, 1)          f32 bias
        # o_ref  : (1, TCo, TH*Wr)   flat, lane-dense output slab
        # col_ref: (K, TH*Wr)        VMEM scratch: K-folded ("im2col") operand
        #
        # Stage the kH*kW shifted slices into the scratch (static offsets;
        # column "spill" past each row's Wo-th entry only lands in cropped
        # columns, so no masking is needed).
        for kh in range(kH):
            for kw in range(kW):
                t = kh * kW + kw
                s0 = kh * Wr + kw
                col_ref[t * Cin:(t + 1) * Cin, :] = x_ref[0, 0, :, s0:s0 + L]
        # One MXU matmul per grid step: (TCo, K) x (K, TH*Wr) -> f32 accum.
        acc = jnp.dot(w_ref[...], col_ref[...],
                      preferred_element_type=jnp.float32)
        # Bias hoisted out of any per-row loop; single lane-dense store.
        o_ref[0, :, :] = (acc + b_ref[...]).astype(o_ref.dtype)

    return kernel


def conv_transpose2d_pallas(x, weight, bias, *, stride=(1, 1), padding=(0, 0),
                            output_padding=(0, 0), groups=1, dilation=(1, 1),
                            compute_dtype=jnp.bfloat16):
    """Matches F.conv_transpose2d(x, weight, bias, stride, padding,
    output_padding, groups, dilation) for groups=1, dilation=(1,1)."""
    assert groups == 1, "groups != 1 not supported"
    assert dilation == (1, 1), "dilation != 1 not supported"
    N, Cin, H, W = x.shape
    Cin_w, Cout, kH, kW = weight.shape
    assert Cin == Cin_w
    sH, sW = stride
    pH, pW = padding
    opH, opW = output_padding

    Ho = (H - 1) * sH - 2 * pH + (kH - 1) + opH + 1
    Wo = (W - 1) * sW - 2 * pW + (kW - 1) + opW + 1
    assert Ho > 0 and Wo > 0, (Ho, Wo)

    Hp = Ho + kH - 1
    Wp = Wo + kW - 1
    K = kH * kW * Cin
    cdt = jnp.dtype(compute_dtype)
    out_dtype = x.dtype

    # ---- Cout tiling (bounds the f32 accumulator, adds parallel grid work) --
    if Cout <= 128:
        TCo, Cout_pad = Cout, Cout
    else:
        TCo = 128
        Cout_pad = _cdiv(Cout, TCo) * TCo
    n_co = Cout_pad // TCo

    # ---- Row tiling: lane-dense output slabs of TH rows x Wr lanes ----------
    # Keep the f32 accumulator (TCo, TH*Wr) within ~128 KiB (half vreg file).
    lane_cap = max(256, (128 * 1024 // 4) // TCo)
    if Ho * Wp <= lane_cap:
        Wr, TH = Wp, Ho                          # single tile: block == full dims
    else:
        Wr = _cdiv(Wp, 8) * 8                    # row stride multiple of 8 ...
        th_unit = 128 // math.gcd(Wr, 128)       # ... so TH*Wr is 128-aligned
        TH = th_unit * max(1, lane_cap // (th_unit * Wr))
        TH = min(TH, th_unit * _cdiv(Ho, th_unit))
    Ho_pad = _cdiv(Ho, TH) * TH
    n_tiles = Ho_pad // TH
    TH_halo = TH + kH - 1
    Lw = _cdiv(TH_halo * Wr + (kW - 1), 128) * 128

    # ---- Input: zero-dilate (stride) + conv_transpose border pad in one pad -
    # (negative edge padding == cropping handles padding > k-1; interior
    # dilation is applied before edge padding, matching conv_transpose).
    x_pad = lax.pad(
        x.astype(cdt), jnp.array(0, cdt),
        ((0, 0, 0), (0, 0, 0),
         (kH - 1 - pH, kH - 1 - pH + opH, sH - 1),
         (kW - 1 - pW, kW - 1 - pW + opW, sW - 1)))            # (N,Cin,Hp,Wp)
    Hneed = Ho_pad + kH - 1
    x_pad = jnp.pad(x_pad, ((0, 0), (0, 0), (0, Hneed - Hp), (0, Wr - Wp)))
    # Per-row-tile slabs with a (kH-1)-row halo, rows flattened at stride Wr,
    # plus zero slack so every static in-kernel window read stays in bounds.
    x_tiles = jnp.stack(
        [x_pad[:, :, j * TH:j * TH + TH_halo, :] for j in range(n_tiles)],
        axis=1).reshape(N, n_tiles, Cin, TH_halo * Wr)
    x_tiles = jnp.pad(x_tiles,
                      ((0, 0), (0, 0), (0, 0), (0, Lw - TH_halo * Wr)))

    # ---- K-folded weights: wK[co,(kh*kW+kw)*Cin+ci] = w[ci,co,kH-1-kh,kW-1-kw]
    w_flip = weight[:, :, ::-1, ::-1].astype(cdt)              # (Cin,Cout,kH,kW)
    wK = jnp.transpose(w_flip, (1, 2, 3, 0)).reshape(Cout, K)
    if Cout_pad != Cout:
        wK = jnp.pad(wK, ((0, Cout_pad - Cout), (0, 0)))

    if bias is None:
        bias = jnp.zeros((Cout,), jnp.float32)
    b2 = bias.astype(jnp.float32).reshape(Cout, 1)
    if Cout_pad != Cout:
        b2 = jnp.pad(b2, ((0, Cout_pad - Cout), (0, 0)))

    kernel = _make_kernel(kH, kW, Cin, Wr, TH)

    # ---- VMEM budget: double-buffered blocks + im2col scratch, capped at
    # 48 MiB so it always fits under v7x's 64 MiB per-TC VMEM.
    esz_c = cdt.itemsize
    esz_o = jnp.dtype(out_dtype).itemsize
    blk_bytes = (Cin * Lw * esz_c + TCo * K * esz_c + TCo * 4
                 + TCo * TH * Wr * esz_o)
    vmem_need = 2 * blk_bytes + K * TH * Wr * esz_c
    vmem_limit = int(min(max(2 * vmem_need + (16 << 20), 32 << 20), 48 << 20))

    cost = pl.CostEstimate(
        flops=int(2 * N * Cout_pad * K * Ho_pad * Wr),
        transcendentals=0,
        bytes_accessed=int(x_tiles.size * esz_c + wK.size * esz_c
                           + b2.size * 4
                           + N * Cout_pad * Ho_pad * Wr * esz_o))

    out_flat = pl.pallas_call(
        kernel,
        out_shape=jax.ShapeDtypeStruct((N, Cout_pad, Ho_pad * Wr), out_dtype),
        grid_spec=pltpu.PrefetchScalarGridSpec(
            num_scalar_prefetch=0,
            grid=(N, n_co, n_tiles),
            in_specs=[
                pl.BlockSpec((1, 1, Cin, Lw), lambda n, c, j: (n, j, 0, 0)),
                pl.BlockSpec((TCo, K), lambda n, c, j: (c, 0)),
                pl.BlockSpec((TCo, 1), lambda n, c, j: (c, 0)),
            ],
            out_specs=pl.BlockSpec((1, TCo, TH * Wr),
                                   lambda n, c, j: (n, c, j)),
            scratch_shapes=[pltpu.VMEM((K, TH * Wr), cdt)],
        ),
        compiler_params=pltpu.CompilerParams(
            dimension_semantics=("parallel", "parallel", "parallel"),
            vmem_limit_bytes=vmem_limit,
        ),
        cost_estimate=cost,
    )(x_tiles, wK, b2)

    # One wrapper slice folds the Cout / row / width crops.
    out = out_flat.reshape(N, Cout_pad, Ho_pad, Wr)[:, :Cout, :Ho, :Wo]
    return out


def _reference_conv_transpose2d(x, weight, bias, stride, padding, output_padding):
    """Pure lax reference (same semantics as PyTorch conv_transpose2d)."""
    Cin, Cout, kH, kW = weight.shape
    sH, sW = stride
    pH, pW = padding
    opH, opW = output_padding
    rhs = jnp.transpose(weight[:, :, ::-1, ::-1], (1, 0, 2, 3))  # (Cout,Cin,kH,kW)
    out = lax.conv_general_dilated(
        x.astype(jnp.float32), rhs.astype(jnp.float32),
        window_strides=(1, 1),
        padding=((kH - 1 - pH, kH - 1 - pH + opH),
                 (kW - 1 - pW, kW - 1 - pW + opW)),
        lhs_dilation=(sH, sW),
        dimension_numbers=('NCHW', 'OIHW', 'NCHW'),
    )
    return out + bias.reshape(1, -1, 1, 1)


if __name__ == "__main__":
    def run_case(key, N, Cin, Cout, H, W, k, stride, padding, output_padding,
                 compute_dtype, tol):
        kx, kw_, kb = jax.random.split(key, 3)
        x = jax.random.normal(kx, (N, Cin, H, W), dtype=jnp.float32)
        fan = Cin * k * k
        weight = jax.random.uniform(kw_, (Cin, Cout, k, k), jnp.float32,
                                    -1.0, 1.0) / math.sqrt(fan)
        bias = jax.random.uniform(kb, (Cout,), jnp.float32,
                                  -1.0, 1.0) / math.sqrt(fan)
        fwd = jax.jit(functools.partial(
            conv_transpose2d_pallas, stride=stride, padding=padding,
            output_padding=output_padding, groups=1, dilation=(1, 1),
            compute_dtype=compute_dtype))
        out = fwd(x, weight, bias)
        jax.block_until_ready(out)
        # Reference sees the same input rounding as the kernel's compute dtype
        # (products are then exact; f32 accumulation on both sides).
        xr = x.astype(compute_dtype).astype(jnp.float32)
        wr = weight.astype(compute_dtype).astype(jnp.float32)
        ref = _reference_conv_transpose2d(xr, wr, bias, stride, padding,
                                          output_padding)
        assert out.shape == ref.shape, (out.shape, ref.shape)
        err = float(jnp.max(jnp.abs(out.astype(jnp.float32) - ref)))
        assert err < tol, (err, tol)

    key = jax.random.PRNGKey(0)
    ks = jax.random.split(key, 5)
    # MetaConvTranspose2d(4, 8, kernel_size=3, stride=2, padding=1,
    #                     output_padding=1) on x:(2,4,8,8) — default bf16 feed.
    run_case(ks[0], N=2, Cin=4, Cout=8, H=8, W=8, k=3, stride=(2, 2),
             padding=(1, 1), output_padding=(1, 1),
             compute_dtype=jnp.bfloat16, tol=5e-3)
    # Same config, f32 compute path (strict parity with the reference).
    run_case(ks[1], N=2, Cin=4, Cout=8, H=8, W=8, k=3, stride=(2, 2),
             padding=(1, 1), output_padding=(1, 1),
             compute_dtype=jnp.float32, tol=1e-4)
    # Ragged spatial size, stride 1 (exercises the row/width crop path).
    run_case(ks[2], N=1, Cin=3, Cout=5, H=13, W=10, k=3, stride=(1, 1),
             padding=(1, 1), output_padding=(0, 0),
             compute_dtype=jnp.bfloat16, tol=5e-3)
    # Larger upsampling: exercises the multi-row-tile grid axis.
    run_case(ks[3], N=1, Cin=8, Cout=16, H=32, W=32, k=3, stride=(2, 2),
             padding=(1, 1), output_padding=(1, 1),
             compute_dtype=jnp.bfloat16, tol=5e-3)
    # Cout > 128: exercises the Cout-tile grid axis + output-channel crop.
    run_case(ks[4], N=1, Cin=4, Cout=160, H=8, W=8, k=3, stride=(2, 2),
             padding=(1, 1), output_padding=(1, 1),
             compute_dtype=jnp.bfloat16, tol=5e-3)
    print("KERNEL_OK")
</pallas_src>

<mosaic_0001>
module attributes {stable_mosaic.version = 11 : i64} {
  func.func @kernel(%arg0: i32, %arg1: i32, %arg2: i32, %arg3: memref<1x1x4x384xbf16, #tpu.memory_space<vmem>>, %arg4: memref<8x36xbf16, #tpu.memory_space<vmem>>, %arg5: memref<8x1xf32, #tpu.memory_space<vmem>>, %arg6: memref<1x8x288xf32, #tpu.memory_space<vmem>>, %arg7: memref<36x288xbf16, #tpu.memory_space<vmem>>) attributes {dimension_semantics = [#tpu.dimension_semantics<parallel>, #tpu.dimension_semantics<parallel>, #tpu.dimension_semantics<parallel>], iteration_bounds = array<i64: 2, 1, 1>, scalar_prefetch = 0 : i64, scratch_operands = 1 : i64, tpu.core_type = #tpu.core_type<tc>, window_params = [{transform_indices = @transform_0, window_bounds = array<i64: 1, 1, 4, 384>}, {transform_indices = @transform_1, window_bounds = array<i64: 8, 36>}, {transform_indices = @transform_2, window_bounds = array<i64: 8, 1>}, {transform_indices = @transform_3, window_bounds = array<i64: 1, 8, 288>}]} {
    %c0 = arith.constant 0 : index
    %c0_0 = arith.constant 0 : index
    %c0_1 = arith.constant 0 : index
    %c0_2 = arith.constant 0 : index
    %0 = vector.load %arg3[%c0, %c0_0, %c0_1, %c0_2] : memref<1x1x4x384xbf16, #tpu.memory_space<vmem>>, vector<1x1x4x288xbf16>
    %1 = vector.shape_cast %0 : vector<1x1x4x288xbf16> to vector<4x288xbf16>
    %c0_3 = arith.constant 0 : index
    %c0_4 = arith.constant 0 : index
    %2 = vector.load %arg7[%c0_3, %c0_4] : memref<36x288xbf16, #tpu.memory_space<vmem>>, vector<4x288xbf16>
    tpu.vector_store %arg7[%c0_3, %c0_4], %1 {strides = array<i32>} : memref<36x288xbf16, #tpu.memory_space<vmem>>, vector<4x288xbf16>,
    %c0_5 = arith.constant 0 : index
    %c0_6 = arith.constant 0 : index
    %c0_7 = arith.constant 0 : index
    %c1 = arith.constant 1 : index
    %3 = vector.load %arg3[%c0_5, %c0_6, %c0_7, %c1] : memref<1x1x4x384xbf16, #tpu.memory_space<vmem>>, vector<1x1x4x288xbf16>
    %4 = vector.shape_cast %3 : vector<1x1x4x288xbf16> to vector<4x288xbf16>
    %c4 = arith.constant 4 : index
    %c0_8 = arith.constant 0 : index
    %5 = vector.load %arg7[%c4, %c0_8] : memref<36x288xbf16, #tpu.memory_space<vmem>>, vector<4x288xbf16>
    tpu.vector_store %arg7[%c4, %c0_8], %4 {strides = array<i32>} : memref<36x288xbf16, #tpu.memory_space<vmem>>, vector<4x288xbf16>,
    %c0_9 = arith.constant 0 : index
    %c0_10 = arith.constant 0 : index
    %c0_11 = arith.constant 0 : index
    %c2 = arith.constant 2 : index
    %6 = vector.load %arg3[%c0_9, %c0_10, %c0_11, %c2] : memref<1x1x4x384xbf16, #tpu.memory_space<vmem>>, vector<1x1x4x288xbf16>
    %7 = vector.shape_cast %6 : vector<1x1x4x288xbf16> to vector<4x288xbf16>
    %c8 = arith.constant 8 : index
    %c0_12 = arith.constant 0 : index
    %8 = vector.load %arg7[%c8, %c0_12] : memref<36x288xbf16, #tpu.memory_space<vmem>>, vector<4x288xbf16>
    tpu.vector_store %arg7[%c8, %c0_12], %7 {strides = array<i32>} : memref<36x288xbf16, #tpu.memory_space<vmem>>, vector<4x288xbf16>,
    %c0_13 = arith.constant 0 : index
    %c0_14 = arith.constant 0 : index
    %c0_15 = arith.constant 0 : index
    %c18 = arith.constant 18 : index
    %9 = vector.load %arg3[%c0_13, %c0_14, %c0_15, %c18] : memref<1x1x4x384xbf16, #tpu.memory_space<vmem>>, vector<1x1x4x288xbf16>
    %10 = vector.shape_cast %9 : vector<1x1x4x288xbf16> to vector<4x288xbf16>
    %c12 = arith.constant 12 : index
    %c0_16 = arith.constant 0 : index
    %11 = vector.load %arg7[%c12, %c0_16] : memref<36x288xbf16, #tpu.memory_space<vmem>>, vector<4x288xbf16>
    tpu.vector_store %arg7[%c12, %c0_16], %10 {strides = array<i32>} : memref<36x288xbf16, #tpu.memory_space<vmem>>, vector<4x288xbf16>,
    %c0_17 = arith.constant 0 : index
    %c0_18 = arith.constant 0 : index
    %c0_19 = arith.constant 0 : index
    %c19 = arith.constant 19 : index
    %12 = vector.load %arg3[%c0_17, %c0_18, %c0_19, %c19] : memref<1x1x4x384xbf16, #tpu.memory_space<vmem>>, vector<1x1x4x288xbf16>
    %13 = vector.shape_cast %12 : vector<1x1x4x288xbf16> to vector<4x288xbf16>
    %c16 = arith.constant 16 : index
    %c0_20 = arith.constant 0 : index
    %14 = vector.load %arg7[%c16, %c0_20] : memref<36x288xbf16, #tpu.memory_space<vmem>>, vector<4x288xbf16>
    tpu.vector_store %arg7[%c16, %c0_20], %13 {strides = array<i32>} : memref<36x288xbf16, #tpu.memory_space<vmem>>, vector<4x288xbf16>,
    %c0_21 = arith.constant 0 : index
    %c0_22 = arith.constant 0 : index
    %c0_23 = arith.constant 0 : index
    %c20 = arith.constant 20 : index
    %15 = vector.load %arg3[%c0_21, %c0_22, %c0_23, %c20] : memref<1x1x4x384xbf16, #tpu.memory_space<vmem>>, vector<1x1x4x288xbf16>
    %16 = vector.shape_cast %15 : vector<1x1x4x288xbf16> to vector<4x288xbf16>
    %c20_24 = arith.constant 20 : index
    %c0_25 = arith.constant 0 : index
    %17 = vector.load %arg7[%c20_24, %c0_25] : memref<36x288xbf16, #tpu.memory_space<vmem>>, vector<4x288xbf16>
    tpu.vector_store %arg7[%c20_24, %c0_25], %16 {strides = array<i32>} : memref<36x288xbf16, #tpu.memory_space<vmem>>, vector<4x288xbf16>,
    %c0_26 = arith.constant 0 : index
    %c0_27 = arith.constant 0 : index
    %c0_28 = arith.constant 0 : index
    %c36 = arith.constant 36 : index
    %18 = vector.load %arg3[%c0_26, %c0_27, %c0_28, %c36] : memref<1x1x4x384xbf16, #tpu.memory_space<vmem>>, vector<1x1x4x288xbf16>
    %19 = vector.shape_cast %18 : vector<1x1x4x288xbf16> to vector<4x288xbf16>
    %c24 = arith.constant 24 : index
    %c0_29 = arith.constant 0 : index
    %20 = vector.load %arg7[%c24, %c0_29] : memref<36x288xbf16, #tpu.memory_space<vmem>>, vector<4x288xbf16>
    tpu.vector_store %arg7[%c24, %c0_29], %19 {strides = array<i32>} : memref<36x288xbf16, #tpu.memory_space<vmem>>, vector<4x288xbf16>,
    %c0_30 = arith.constant 0 : index
    %c0_31 = arith.constant 0 : index
    %c0_32 = arith.constant 0 : index
    %c37 = arith.constant 37 : index
    %21 = vector.load %arg3[%c0_30, %c0_31, %c0_32, %c37] : memref<1x1x4x384xbf16, #tpu.memory_space<vmem>>, vector<1x1x4x288xbf16>
    %22 = vector.shape_cast %21 : vector<1x1x4x288xbf16> to vector<4x288xbf16>
    %c28 = arith.constant 28 : index
    %c0_33 = arith.constant 0 : index
    %23 = vector.load %arg7[%c28, %c0_33] : memref<36x288xbf16, #tpu.memory_space<vmem>>, vector<4x288xbf16>
    tpu.vector_store %arg7[%c28, %c0_33], %22 {strides = array<i32>} : memref<36x288xbf16, #tpu.memory_space<vmem>>, vector<4x288xbf16>,
    %c0_34 = arith.constant 0 : index
    %c0_35 = arith.constant 0 : index
    %c0_36 = arith.constant 0 : index
    %c38 = arith.constant 38 : index
    %24 = vector.load %arg3[%c0_34, %c0_35, %c0_36, %c38] : memref<1x1x4x384xbf16, #tpu.memory_space<vmem>>, vector<1x1x4x288xbf16>
    %25 = vector.shape_cast %24 : vector<1x1x4x288xbf16> to vector<4x288xbf16>
    %c32 = arith.constant 32 : index
    %c0_37 = arith.constant 0 : index
    %26 = vector.load %arg7[%c32, %c0_37] : memref<36x288xbf16, #tpu.memory_space<vmem>>, vector<4x288xbf16>
    tpu.vector_store %arg7[%c32, %c0_37], %25 {strides = array<i32>} : memref<36x288xbf16, #tpu.memory_space<vmem>>, vector<4x288xbf16>,
    %c0_38 = arith.constant 0 : index
    %c0_39 = arith.constant 0 : index
    %27 = vector.load %arg4[%c0_38, %c0_39] : memref<8x36xbf16, #tpu.memory_space<vmem>>, vector<8x36xbf16>
    %c0_40 = arith.constant 0 : index
    %c0_41 = arith.constant 0 : index
    %28 = vector.load %arg7[%c0_40, %c0_41] : memref<36x288xbf16, #tpu.memory_space<vmem>>, vector<36x288xbf16>
    %cst = arith.constant dense<0.000000e+00> : vector<8x288xf32>
    %29 = tpu.matmul %27, %28, %cst {dimension_numbers = #tpu.dot_dimension_numbers<[1], [0], [0], [1], [0, 0, 1, 1], [], []>} : vector<8x36xbf16>, vector<36x288xbf16>, vector<8x288xf32> -> vector<8x288xf32>
    %c0_42 = arith.constant 0 : index
    %c0_43 = arith.constant 0 : index
    %30 = vector.load %arg5[%c0_42, %c0_43] : memref<8x1xf32, #tpu.memory_space<vmem>>, vector<8x1xf32>
    %31 = vector.broadcast %30 : vector<8x1xf32> to vector<8x288xf32>
    %32 = arith.addf %29, %31 : vector<8x288xf32>
    %c0_44 = arith.constant 0 : index
    %c0_45 = arith.constant 0 : index
    %c0_46 = arith.constant 0 : index
    %33 = vector.load %arg6[%c0_44, %c0_45, %c0_46] : memref<1x8x288xf32, #tpu.memory_space<vmem>>, vector<1x8x288xf32>
    %34 = vector.shape_cast %33 : vector<1x8x288xf32> to vector<8x288xf32>
    %35 = vector.shape_cast %32 : vector<8x288xf32> to vector<1x8x288xf32>
    tpu.vector_store %arg6[%c0_44, %c0_45, %c0_46], %35 {strides = array<i32>} : memref<1x8x288xf32, #tpu.memory_space<vmem>>, vector<1x8x288xf32>,
    return
  }
  func.func @transform_0(%arg0: i32, %arg1: i32, %arg2: i32) -> (i32, i32, i32, i32) {
    %c0_i32 = arith.constant 0 : i32
    %c0_i32_0 = arith.constant 0 : i32
    %c0_i32_1 = arith.constant 0 : i32
    return %arg0, %arg2, %c0_i32, %c0_i32_0 : i32, i32, i32, i32
  }
  func.func @transform_1(%arg0: i32, %arg1: i32, %arg2: i32) -> (i32, i32) {
    %c0_i32 = arith.constant 0 : i32
    %c0_i32_0 = arith.constant 0 : i32
    return %arg1, %c0_i32 : i32, i32
  }
  func.func @transform_2(%arg0: i32, %arg1: i32, %arg2: i32) -> (i32, i32) {
    %c0_i32 = arith.constant 0 : i32
    %c0_i32_0 = arith.constant 0 : i32
    return %arg1, %c0_i32 : i32, i32
  }
  func.func @transform_3(%arg0: i32, %arg1: i32, %arg2: i32) -> (i32, i32, i32) {
    %c0_i32 = arith.constant 0 : i32
    return %arg0, %arg1, %arg2 : i32, i32, i32
  }
}

</mosaic_0001>

<bundles_post_ra>
// kernel: conv_transpose2d_pallas.1
= control target key start
LH: loop header
LB: loop body
LE: loop exit
PB: predicated region body
PF: predicated region fallthrough
CT: control target
= control target key end

     0   :  { %s972_s12 = smov 0   ;;  %s974_s13 = smov 0   ;;  %s1069_s0 = inlined_call_operand.vmem [shape: bf16[2,1,4,384], index: 0, kind: input, shape index: {}]   ;;  %s1070_s1 = inlined_call_operand.vmem [shape: bf16[8,36], index: 1, kind: input, shape index: {}]   ;;  %s1071_s2 = inlined_call_operand.vmem [shape: f32[8,1], index: 2, kind: input, shape index: {}]   ;;  %s1072_s3 = inlined_call_operand.vmem [shape: f32[2,8,288], index: 3, kind: output, shape index: {}]  }
   0x1   :  { %s976_s14 = smov 0  }
   0x2 LB: > { %s32_s15 = sadd.s32 1, %s934_s13  ;;  %p825_p0 = scmp.ge.s32.totalorder %s938_s14, 1  ;;  %s938_s14 = sphi %s976_s14, %s13_s14   ;;  %s934_s13 = sphi %s974_s13, %s1074_s13   ;;  %s930_s12 = sphi %s972_s12, %s1073_s12  }
   0x3   : > { %p34_p1 = scmp.ge.s32.totalorder %s32_s15, 2  ;;  %p184_p2 = scmp.lt.s32.totalorder %s938_s14, 3 }
   0x5   : > { %s1076_s15 = smov (%p34_p1, %s32_s15), 0  ;;  %p185_p3 = pnand %p825_p0, %p184_p2 }
   0x6   : > { %p228_p4 = scmp.lt.s32.totalorder (!%p185_p3), %s930_s12, 1  ;;  %s941_s20 = smov (!%p185_p3), 90  }
   0x7   : > { %188 = sbr.rel (%p185_p3) target bundleno = 379 (0x17b), region = 32  ;;  %s942_s21 = smov (!%p185_p3), 109  }
   0x8   : > { %s943_s22 = smov (!%p185_p3), 92   ;;  %s944_s23 = smov (!%p185_p3), 108  }
   0x9   : > { %s946_s24 = smov (!%p185_p3), 91   ;;  %s947_s25 = smov (!%p185_p3), 127  }
   0xa   : > { %s948_s26 = smov (!%p185_p3), 126   ;;  %s950_s27 = smov (!%p185_p3), 110  }
   0xc   : > { %v273_v0 = vlaneseq  ;;  %v940_v1 = vmov 1983009808   ;;  %s1078_s12 = smov (!%p228_p4, %s930_s12), 1  ;;  %vm280_vm0 = vcmask 254976   ;;  %v945_v24 = vmov 0.0   ;;  %v535_v43 = vld [vmem:[%s1071_s2] sm:$0xff] }
   0xd   : > { %v271_v2 = vunpack.c.l.s4 %v940_v1  ;;  %s857_s16 = smul.u32 6, %s1078_s12  ;;  %847 = vmatprep.subr.bf16.mxu1 %v945_v24  ;;  %vm949_vm1 = vmmov 0   ;;  %v951_v42 = vmov 0   ;;  %vm312_vm2 = vcmask 257026  }
   0xe   : > { %v274_v3 = vshrl.u32 %v273_v0, 7  ;;  %853 = vmatprep.mubr.msk.bf16.mxu1 %vm949_vm1, %v945_v24  ;;  %627 = vmatprep.mubr.bf16.mxu0 %v951_v42  ;;  %vm305_vm3 = vcmask 1043456   ;;  %vm518_vm4 = vcmask 736256   ;;  %vm398_vm5 = vcmask 891904   ;;  %s858_s5 = smul.u32 24, %s1078_s12 }
   0xf   : > { %v272_v4 = vunpack.c.0.s8 %v271_v2  ;;  %s998_s19 = scalar_lea.vmem %s1069_s0, %s857_s16  ;;  %895 = vset.pattern.permute.xlu0 %v951_v42  ;;  %vm428_vm6 = vcmask 883712   ;;  %vm458_vm7 = vcmask 752640   ;;  %vm585_vm8 = vcmask 1041408  }
  0x10   : > { %v494_v6 = vld [vmem:[%s998_s19] sm:$0x3f]  ;;  %vm488_vm9 = vcmask 744448   ;;  %vm307_vm10 = vcmask 1039360   ;;  %vm338_vm11 = vcmask 1031168   ;;  %vm368_vm12 = vcmask 900096   ;;  %s257_s8 = scalar_lea.vmem %s1072_s3, %s858_s5 }
  0x11   : > { %v993_v5 = vsub.s32 %v272_v4, %v274_v3  ;;  %v374_v7 = vld [vmem:[%s998_s19] sm:$0x3f]  ;;  %v496_v12 = vcombine.high %v494_v6, %v494_v6  ;;  %vm581_vm13 = vcmask 293888   ;;  %vm678_vm14 = vcmask 261120  }
  0x12   : > { %v434_v8 = vld [vmem:[%s998_s19] sm:$0x3f]  ;;  %v376_v14 = vcombine.high %v374_v7, %v374_v7 }
  0x13   : > { %v503_v9 = vrot.slane %v494_v6, %v993_v5  ;;  %v383_v10 = vrot.slane %v374_v7, %v993_v5  ;;  %v404_v11 = vld [vmem:[%s998_s19] sm:$0x3f]  ;;  %v443_v15 = vrot.slane %v434_v8, %v993_v5  ;;  %v510_v19 = vrot.slane %v496_v12, %v993_v5 }
  0x14   : > { %v260_v13 = vld [vmem:[%s998_s19] sm:$0x3f]  ;;  %v420_v16 = vrot.slane %v404_v11, %v993_v5  ;;  %v406_v17 = vcombine.low %v404_v11, %v404_v11  ;;  %v390_v20 = vrot.slane %v376_v14, %v993_v5  ;;  %v436_v21 = vcombine.high %v434_v8, %v434_v8 }
  0x15   : > { %511 = vrot.lane.b32.xlu0 %v503_v9, %s941_s20  ;;  %391 = vrot.lane.b32.xlu1 %v383_v10, %s942_s21  ;;  %828 = vst.sshfl [vmem:[#allocation2] sm:$0xf pattern:$0x76325410] %v260_v13  ;;  %v262_v18 = vcombine.high %v260_v13, %v260_v13  ;;  %v464_v22 = vld [vmem:[%s998_s19] sm:$0x3f] }
  0x16   : > { %v413_v25 = vrot.slane %v406_v17, %v993_v5  ;;  %v450_v26 = vrot.slane %v436_v21, %v993_v5  ;;  %v466_v27 = vcombine.low %v464_v22, %v464_v22  ;;  %v282_v28 = vld [vmem:[%s998_s19] sm:$0x3f]  ;;  %v480_v30 = vrot.slane %v464_v22, %v993_v5 }
  0x17   : > { %v276_v23 = vrot.slane %v262_v18, %v993_v5  ;;  %v284_v31 = vcombine.low %v282_v28, %v282_v28  ;;  %v314_v32 = vld [vmem:[%s998_s19] sm:$0x3f]  ;;  %v298_v33 = vrot.slane %v282_v28, %v993_v5 }
  0x18   : > { %v473_v29 = vrot.slane %v466_v27, %v993_v5  ;;  %v316_v35 = vcombine.high %v314_v32, %v314_v32  ;;  %v344_v36 = vld [vmem:[%s998_s19] sm:$0x3f]  ;;  %v323_v38 = vrot.slane %v314_v32, %v993_v5 }
  0x19   : > { %451 = vrot.lane.b32.xlu0 %v443_v15, %s943_s22  ;;  %423 = vrot.lane.b32.xlu1 %v420_v16, %s944_s23  ;;  %281 = vst.msk [vmem:[#allocation2 + $0x8] sm:$0x3] %vm280_vm0, %v276_v23  ;;  %v291_v34 = vrot.slane %v284_v31, %v993_v5  ;;  %v346_v39 = vcombine.low %v344_v36, %v344_v36 }
  0x1a   : > { %v330_v37 = vrot.slane %v316_v35, %v993_v5  ;;  %v360_v40 = vrot.slane %v344_v36, %v993_v5 }
  0x1b   : > { %v353_v41 = vrot.slane %v346_v39, %v993_v5 }
  0x1d   : > { %513 = vrot.lane.b32.xlu0 %v510_v19, %s941_s20  ;;  %393 = vrot.lane.b32.xlu1 %v390_v20, %s942_s21 }
  0x21   : > { %421 = vrot.lane.b32.xlu0 %v413_v25, %s944_s23  ;;  %453 = vrot.lane.b32.xlu1 %v450_v26, %s943_s22 }
  0x25   : > { %481 = vrot.lane.b32.xlu0 %v473_v29, %s946_s24  ;;  %483 = vrot.lane.b32.xlu1 %v480_v30, %s946_s24 }
  0x29   : > { %301 = vrot.lane.b32.xlu1 %v298_v33, %s947_s25  ;;  %299 = vrot.lane.b32.xlu0 %v291_v34, %s947_s25 }
  0x2d   : > { %333 = vrot.lane.b32.xlu1 %v330_v37, %s948_s26  ;;  %331 = vrot.lane.b32.xlu0 %v323_v38, %s948_s26 }
  0x31   : > { %363 = vrot.lane.b32.xlu1 %v360_v40, %s950_s27  ;;  %361 = vrot.lane.b32.xlu0 %v353_v41, %s950_s27 }
  0x35   : > { %538 = vperm.xlu0 %895, %v535_v43  }
  0x87   : > { %v512_v44 = vpop.permute.xlu0 %511  ;;  %v392_v45 = vpop.permute.xlu1 %391 }
  0x88   : > { %v515_v50 = vrot.slane %v512_v44, 4  ;;  %v395_v51 = vrot.slane %v392_v45, 4 }
  0x8b   : > { %v452_v46 = vpop.permute.xlu0 %451  ;;  %v424_v47 = vpop.permute.xlu1 %423 }
  0x8c   : > { %433 = vst.msk [vmem:[#allocation2 + $0x20] sm:$0xc] %vm312_vm2, %v424_v47  ;;  %v455_v60 = vrot.slane %v452_v46, 4  ;;  %v426_v61 = vrot.slane %v424_v47, 4 }
  0x8f   : > { %v514_v48 = vpop.permute.xlu0 %513  ;;  %v394_v49 = vpop.permute.xlu1 %393 }
  0x90   : > { %v516_v52 = vrot.slane %v514_v48, 4  ;;  %523 = vst.msk [vmem:[#allocation2 + $0x38] sm:$0x3] %vm280_vm0, %v514_v48  ;;  %v396_v53 = vrot.slane %v394_v49, 4  ;;  %403 = vst.msk [vmem:[#allocation2 + $0x20] sm:$0x3] %vm280_vm0, %v394_v49 }
  0x92   : > { %v517_v54 = vsel %vm305_vm3, %v515_v50, %v516_v52  ;;  %v397_v55 = vsel %vm305_vm3, %v395_v51, %v396_v53 }
  0x93   : > { %v519_v56 = vsel %vm518_vm4, %v512_v44, %v517_v54  ;;  %v399_v57 = vsel %vm398_vm5, %v392_v45, %v397_v55  ;;  %v422_v58 = vpop.permute.xlu0 %421  ;;  %v454_v59 = vpop.permute.xlu1 %453 }
  0x94   : > { %522 = vst [vmem:[#allocation2 + $0x30] sm:$0x33] %v519_v56  ;;  %402 = vst [vmem:[#allocation2 + $0x18] sm:$0x33] %v399_v57  ;;  %v425_v62 = vrot.slane %v422_v58, 4  ;;  %v456_v63 = vrot.slane %v454_v59, 4 }
  0x95   : > { %463 = vst.msk [vmem:[#allocation2 + $0x2c] sm:$0x3] %vm280_vm0, %v454_v59 }
  0x96   : > { %v427_v0 = vsel %vm305_vm3, %v425_v62, %v426_v61  ;;  %v457_v1 = vsel %vm305_vm3, %v455_v60, %v456_v63 }
  0x97   : > { %v429_v2 = vsel %vm428_vm6, %v422_v58, %v427_v0  ;;  %v459_v3 = vsel %vm458_vm7, %v452_v46, %v457_v1  ;;  %v482_v4 = vpop.permute.xlu0 %481  ;;  %v484_v5 = vpop.permute.xlu1 %483  ;;  %v905_v6 = vld [vmem:[#allocation2 + $0x38] ss:$0 sps:$4 sm:$0x33]  }
  0x98   : > { %432 = vst [vmem:[#allocation2 + $0x18] sm:$0xcc] %v429_v2  ;;  %462 = vst [vmem:[#allocation2 + $0x24] sm:$0x33] %v459_v3  ;;  %v485_v7 = vrot.slane %v482_v4, 4  ;;  %v486_v8 = vrot.slane %v484_v5, 4 }
  0x99   : > { %493 = vst.msk [vmem:[#allocation2 + $0x2c] sm:$0xc] %vm312_vm2, %v484_v5  ;;  %v593_v9 = vsel %vm585_vm8, %v905_v6, 0 }
  0x9a   : > { %v487_v10 = vsel %vm305_vm3, %v485_v7, %v486_v8  ;;  %848 = vmatpush3.bf16.msra.mxu1 %v593_v9 }
  0x9b   : > { %v489_v11 = vsel %vm488_vm9, %v482_v4, %v487_v10  ;;  %v302_v12 = vpop.permute.xlu1 %301  ;;  %v300_v13 = vpop.permute.xlu0 %299  ;;  %v533_v14 = vld [vmem:[#allocation2 + $0x30] sm:$0x33]  ;;  %849 = vmatprep.subr.bf16.mxu1 %v945_v24 }
  0x9c   : > { %492 = vst [vmem:[#allocation2 + $0x24] sm:$0xcc] %v489_v11  ;;  %v304_v15 = vrot.slane %v302_v12, 4  ;;  %313 = vst.msk [vmem:[#allocation2 + $0x8] sm:$0xc] %vm312_vm2, %v302_v12  ;;  %v303_v16 = vrot.slane %v300_v13, 4  ;;  %v836_v17 = vcombine.high %v533_v14, %v533_v14  ;;  %v835_v18 = vcombine.low %v533_v14, %v533_v14 }
  0x9e   : > { %v306_v19 = vsel %vm305_vm3, %v303_v16, %v304_v15  ;;  %838 = vmatprep.subr.msk.bf16.mxu0 %vm585_vm8, %v836_v17  ;;  %v587_v20 = vsel %vm585_vm8, %v835_v18, 0 }
  0x9f   : > { %v308_v21 = vsel %vm307_vm10, %v300_v13, %v306_v19  ;;  %606 = vmatpush1.bf16.msra.mxu0 %v587_v20  ;;  %v334_v22 = vpop.permute.xlu1 %333  ;;  %v332_v23 = vpop.permute.xlu0 %331 }
  0xa0   : > { %v908_v25 = vld [vmem:[#allocation2 + $0x20] ss:$12 sps:$4 sm:$0xff]   ;;  %311 = vst [vmem:[#allocation2] sm:$0xcc] %v308_v21  ;;  %v336_v26 = vrot.slane %v334_v22, 4  ;;  %v335_v27 = vrot.slane %v332_v23, 4 }
  0xa1   : > { %343 = vst.msk [vmem:[#allocation2 + $0x14] sm:$0x3] %vm280_vm0, %v334_v22  ;;  %850 = vmatpush3.bf16.msra.mxu1 %v908_v25 }
  0xa2   : > { %v337_v28 = vsel %vm305_vm3, %v335_v27, %v336_v26  ;;  %851 = vmatprep.subr.bf16.mxu1 %v945_v24  ;;  %v524_v24 = vld [vmem:[%s1070_s1] sm:$0xf] }
  0xa3   : > { %v339_v29 = vsel %vm338_vm11, %v332_v23, %v337_v28  ;;  %v364_v30 = vpop.permute.xlu1 %363  ;;  %v362_v31 = vpop.permute.xlu0 %361  ;;  %v909_v32 = vld [vmem:[#allocation2 + $0x1c] ss:$12 sps:$4 sm:$0xff]   ;;  %v911_v33 = vld [vmem:[#allocation2 + $0x18] ss:$12 sps:$4 sm:$0xff]  }
  0xa4   : > { %342 = vst [vmem:[#allocation2 + $0xc] sm:$0x33] %v339_v29  ;;  %v366_v34 = vrot.slane %v364_v30, 4  ;;  %373 = vst.msk [vmem:[#allocation2 + $0x14] sm:$0xc] %vm312_vm2, %v364_v30  ;;  %v365_v35 = vrot.slane %v362_v31, 4  ;;  %607 = vmatprep.subr.bf16.mxu0 %v909_v32 }
  0xa5   : > { %608 = vmatpush1.bf16.msra.mxu0 %v911_v33 }
  0xa6   : > { %v367_v36 = vsel %vm305_vm3, %v365_v35, %v366_v34 }
  0xa7   : > { %v369_v37 = vsel %vm368_vm12, %v362_v31, %v367_v36 }
  0xa8   : > { %372 = vst [vmem:[#allocation2 + $0xc] sm:$0xcc] %v369_v37 }
  0xab   : > { %v912_v38 = vld [vmem:[#allocation2 + $0x8] ss:$12 sps:$4 sm:$0xff]  }
  0xac   : > { %852 = vmatpush3.bf16.msra.mxu1 %v912_v38 }
  0xaf   : > { %v913_v39 = vld [vmem:[#allocation2 + $0x4] ss:$12 sps:$4 sm:$0xff]   ;;  %v915_v40 = vld [vmem:[#allocation2] ss:$12 sps:$4 sm:$0xff]   ;;  %854 = vmatmul.mubr.msk.bf16.vlgmr.msra.gmra.mxu1 %vm581_vm13, %v524_v24 }
  0xb0   : > { %609 = vmatprep.subr.bf16.mxu0 %v913_v39  ;;  %v539_v41 = vpop.permute.xlu0 %538 }
  0xb1   : > { %610 = vmatpush1.bf16.msra.mxu0 %v915_v40 }
  0xb4   : > { %839 = vmatmul.mubr.msk.bf16.vlgmr.msra.gmra.mxu0 %vm581_vm13, %v524_v24 }
 0x16f   : > { %v670_v42 = vpop.f32.mrf.mxu1 }
 0x170   : > { %v671_v43 = vadd.f32 %v670_v42, %v539_v41 }
 0x171   : > { %v855_v44 = vpop.f32.mrf.mxu1 }
 0x172   : > { %679 = vst.msk [vmem:[%s257_s8 + $0x10] sm:$0xff] %vm678_vm14, %v671_v43 }
 0x173   : > { %v673_v45 = vpop.f32.mrf.mxu1 }
 0x174   : > { %v629_v46 = vpop.f32.mrf.mxu0 }
 0x175   : > { %v630_v47 = vadd.f32 %v629_v46, %v539_v41  ;;  %v856_v48 = vpop.f32.mrf.mxu1 }
 0x176   : > { %v631_v49 = vpop.f32.mrf.mxu0 }
 0x177   : > { %676 = vst [vmem:[%s257_s8] sm:$0xff] %v630_v47  ;;  %v632_v50 = vadd.f32 %v631_v49, %v539_v41 }
 0x178   : > { %v633_v51 = vpop.f32.mrf.mxu0 }
 0x179   : > { %677 = vst [vmem:[%s257_s8 + $0x8] sm:$0xff] %v632_v50 }
 0x17a   : > { %v634_v52 = vpop.f32.mrf.mxu0 }
 0x17b PF: > { %s13_s14 = sadd.s32 1, %s938_s14   ;;  %s1073_s12 = smov %s934_s13 }
 0x17c   : > { %p10_p5 = scmp.ge.s32.totalorder %s13_s14, 4   ;;  %s1074_s13 = smov %s1076_s15 }
 0x17e   :  { %12 = sbr.rel (!%p10_p5) target bundleno = 2 (0x2), region = 68 }

</bundles_post_ra>
